<compile_context>
chip_gen: v7x
topology: tpu7x:2x2x1
jax: 0.10.0
libtpu: 0.0.40
codegen_flags: <defaults>
</compile_context>

<pallas_src>
import jax
import jax.numpy as jnp
import numpy as np
from jax import lax
from jax.experimental import pallas as pl
from jax.experimental.pallas import tpu as pltpu


def _round_up(x, m):
    return ((x + m - 1) // m) * m


def _cdiv(a, b):
    return -(-a // b)


def _vmem_block_bytes(shape2d, itemsize, sublane_pack):
    """VMEM bytes of a (sublane, lane) tile after (sublane_pack, 128) padding."""
    s, l = shape2d
    return _round_up(s, sublane_pack) * _round_up(l, 128) * itemsize


def _pick_doc_tile(Bp, max_tile):
    """Largest multiple of 128 that divides Bp and is <= max_tile (>= 128)."""
    best = 128
    t = 128
    while t <= min(Bp, max_tile):
        if Bp % t == 0:
            best = t
        t += 128
    return best


def _simmat_kernel(qt_ref, dt_ref, qe_ref, de_ref, out_ref):
    # Block shapes (grid = (batch blocks, doc tiles)):
    #   qt_ref:  (Bb, Ap, 1)  raw query token ids (int32)
    #   dt_ref:  (Bb, 1, Bd)  raw doc   token ids (int32)
    #   qe_ref:  (Bb, Ap, H)  bf16 embeddings of clamp(min=0) query tokens
    #   de_ref:  (Bb, H, Bd)  bf16 embeddings of clamp(min=0) doc tokens (pre-transposed)
    #   out_ref: (Bb, Ap, Bd) f32 similarity matrix
    q_tok = qt_ref[...]
    d_tok = dt_ref[...]

    # ---- exact-match branch (clamp(max=0) tokens, padding id 0 excluded) ----
    qx = jnp.minimum(q_tok, 0)
    dx = jnp.minimum(d_tok, 0)
    em = jnp.logical_and(qx == dx, qx < 0).astype(jnp.float32)      # (Bb, Ap, Bd)

    # ---- cosine branch: raw bf16 matmul on the MXU (f32 accumulate), ----
    # ---- normalize after with per-row inverse norms.                  ----
    q_emb = qe_ref[...]                                             # (Bb, Ap, H) bf16
    d_emb = de_ref[...]                                             # (Bb, H, Bd) bf16
    raw = jnp.einsum("bah,bhd->bad", q_emb, d_emb,
                     preferred_element_type=jnp.float32)            # (Bb, Ap, Bd)

    qf = q_emb.astype(jnp.float32)
    df = d_emb.astype(jnp.float32)
    inv_q = lax.rsqrt(jnp.sum(qf * qf, axis=2, keepdims=True) + 1e-18)   # (Bb, Ap, 1)
    inv_d = lax.rsqrt(jnp.sum(df * df, axis=1, keepdims=True) + 1e-18)   # (Bb, 1, Bd)

    cos = raw * inv_q * inv_d
    keep = jnp.logical_and(q_tok > 0, d_tok > 0)                    # (Bb, Ap, Bd)
    out_ref[...] = em + jnp.where(keep, cos, 0.0)


def similarity_matrix(query_tok, doc_tok, emb_table):
    """query_tok: (BAT, A) int, doc_tok: (BAT, B) int, emb_table: (V, H) f32."""
    BAT, A = query_tok.shape
    BAT_d, B = doc_tok.shape
    assert BAT_d == BAT
    H = emb_table.shape[1]

    # Pad doc axis to a lane-dense multiple of 128, query axis to a sublane
    # multiple of 8. Padding uses token id 0 (= module's padding id), so the
    # in-kernel padding masks zero every padded row/column; the wrapper slices
    # them off at the end.
    Ap = _round_up(max(A, 8), 8)
    Bp = _round_up(max(B, 128), 128)
    q_tok = jnp.pad(query_tok.astype(jnp.int32), ((0, 0), (0, Ap - A)))
    d_tok = jnp.pad(doc_tok.astype(jnp.int32), ((0, 0), (0, Bp - B)))

    # Embedding lookup on clamp(min=0) tokens, carried in bf16 (halves HBM
    # traffic; MXU takes bf16 with f32 accumulation). Doc embeddings gathered
    # pre-transposed to (BAT, H, Bp) so the kernel needs no XLU transpose.
    # TODO(synk): fuse this gather into the kernel (scalar-prefetch the ids and
    # DMA-gather rows from an HBM-resident table) to remove the gather's HBM
    # write+read round-trip on the dominant d_emb stream.
    emb_bf16 = emb_table.astype(jnp.bfloat16)
    q_emb = emb_bf16[jnp.maximum(q_tok, 0)]                          # (BAT, Ap, H)
    d_emb = jnp.swapaxes(emb_bf16[jnp.maximum(d_tok, 0)], 1, 2)      # (BAT, H, Bp)

    # ---- generation-aware VMEM budgeting (accounts for 2x double-buffering) ----
    try:
        vmem_cap = int(pltpu.get_tpu_info().vmem_capacity_bytes)
    except Exception:
        vmem_cap = 64 * 1024 * 1024                                  # conservative (v7x)
    # Scoped limit: 3/4 of physical, capped at 96 MiB (-> 96 MiB on v5e/v6e,
    # 48 MiB on v7x). Resident blocks budgeted to 3/4 of that, leaving headroom
    # for compiler scratch / spilled f32 intermediates.
    vmem_limit = min((vmem_cap * 3) // 4, 96 * 1024 * 1024)
    resident_budget = (vmem_limit * 3) // 4

    def per_batch_bytes(bd):
        dbuf = 2 * (
            _vmem_block_bytes((Ap, 1), 4, 8)        # query ids
            + _vmem_block_bytes((1, bd), 4, 8)      # doc ids
            + _vmem_block_bytes((Ap, H), 2, 16)     # query embeddings (bf16)
            + _vmem_block_bytes((H, bd), 2, 16)     # doc embeddings (bf16, transposed)
            + _vmem_block_bytes((Ap, bd), 4, 8)     # output
        )
        # fudge for live f32 intermediates (em / raw / cos) sized like the output tile
        return dbuf + 2 * _vmem_block_bytes((Ap, bd), 4, 8)

    # Doc tile (second grid axis): lane-dense multiple of 128, capped at 512.
    Bd = _pick_doc_tile(Bp, 512)
    while Bd > 128 and per_batch_bytes(Bd) > resident_budget:
        Bd = _pick_doc_tile(Bp, Bd - 128)
    n_doc = Bp // Bd

    # Batch elements per grid step, then keep >= 4 parallel steps when possible
    # so v7x's two TensorCores each get >= 2 pipelined steps.
    Bb = int(max(1, min(BAT, resident_budget // per_batch_bytes(Bd))))
    min_steps = 4
    if Bb > 1 and _cdiv(BAT, Bb) * n_doc < min_steps:
        want_b_steps = _cdiv(min_steps, n_doc)
        Bb = max(1, _cdiv(BAT, want_b_steps))
    BATp = _round_up(BAT, Bb)
    n_b = BATp // Bb

    q_tok3 = q_tok.reshape(BAT, Ap, 1)
    d_tok3 = d_tok.reshape(BAT, 1, Bp)
    if BATp != BAT:
        bpad = ((0, BATp - BAT), (0, 0), (0, 0))
        q_tok3 = jnp.pad(q_tok3, bpad)
        d_tok3 = jnp.pad(d_tok3, bpad)
        q_emb = jnp.pad(q_emb, bpad)
        d_emb = jnp.pad(d_emb, bpad)

    grid_spec = pltpu.PrefetchScalarGridSpec(
        num_scalar_prefetch=0,
        grid=(n_b, n_doc),                                   # doc axis inner: q blocks stay resident
        in_specs=[
            pl.BlockSpec((Bb, Ap, 1), lambda b, j: (b, 0, 0)),
            pl.BlockSpec((Bb, 1, Bd), lambda b, j: (b, 0, j)),
            pl.BlockSpec((Bb, Ap, H), lambda b, j: (b, 0, 0)),
            pl.BlockSpec((Bb, H, Bd), lambda b, j: (b, 0, j)),
        ],
        out_specs=pl.BlockSpec((Bb, Ap, Bd), lambda b, j: (b, 0, j)),
    )

    out = pl.pallas_call(
        _simmat_kernel,
        out_shape=jax.ShapeDtypeStruct((BATp, Ap, Bp), jnp.float32),
        grid_spec=grid_spec,
        compiler_params=pltpu.CompilerParams(
            dimension_semantics=("parallel", "parallel"),
            vmem_limit_bytes=int(vmem_limit),
        ),
    )(q_tok3, d_tok3, q_emb, d_emb)

    return out[:BAT, :A, :B]


def _reference(query_tok, doc_tok, emb_table):
    """Pure-JAX reference mirroring the PyTorch forward exactly (f32)."""
    BAT, A = query_tok.shape
    _, B = doc_tok.shape

    def remove_padding(sim, qt, dt):
        nul = jnp.zeros_like(sim)
        sim = jnp.where(qt.reshape(BAT, A, 1) == 0, nul, sim)
        sim = jnp.where(dt.reshape(BAT, 1, B) == 0, nul, sim)
        return sim

    # exact match on clamp(max=0)
    qx = jnp.minimum(query_tok, 0)
    dx = jnp.minimum(doc_tok, 0)
    em = (qx.reshape(BAT, A, 1) == dx.reshape(BAT, 1, B)).astype(jnp.float32)
    em = remove_padding(em, qx, dx)

    # cosine on clamp(min=0)
    qn = jnp.maximum(query_tok, 0)
    dn = jnp.maximum(doc_tok, 0)
    a_emb = emb_table[qn]
    b_emb = emb_table[dn]
    a_den = jnp.linalg.norm(a_emb, axis=2).reshape(BAT, A, 1) + 1e-9
    b_den = jnp.linalg.norm(b_emb, axis=2).reshape(BAT, 1, B) + 1e-9
    cos = jnp.einsum("bah,bdh->bad", a_emb, b_emb) / (a_den * b_den)
    cos = remove_padding(cos, qn, dn)
    return em + cos


if __name__ == "__main__":
    BAT, A, B, H, VOCAB = 2, 8, 16, 32, 37

    key = jax.random.PRNGKey(0)
    k1, k2, k3 = jax.random.split(key, 3)

    # Deterministic embedding table (synthetic weights, shape (vocab, hidden)).
    emb_table = jax.random.normal(k3, (VOCAB, H), dtype=jnp.float32)

    # Token ids include negatives (special tokens) and zeros (padding).
    query_tok = jax.random.randint(k1, (BAT, A), minval=-2, maxval=VOCAB, dtype=jnp.int32)
    doc_tok = jax.random.randint(k2, (BAT, B), minval=-2, maxval=VOCAB, dtype=jnp.int32)

    out = similarity_matrix(query_tok, doc_tok, emb_table)
    out = jax.block_until_ready(out)

    ref = jax.block_until_ready(_reference(query_tok, doc_tok, emb_table))
    # bf16 embeddings in the kernel vs f32 reference -> tolerance covers bf16 rounding.
    np.testing.assert_allclose(np.asarray(out), np.asarray(ref), rtol=2.5e-2, atol=2.5e-2)

    print("KERNEL_OK")
</pallas_src>

<mosaic_0001>
module attributes {stable_mosaic.version = 11 : i64} {
  func.func @_simmat_kernel(%arg0: i32, %arg1: i32, %arg2: memref<1x8x1xi32, #tpu.memory_space<vmem>>, %arg3: memref<1x1x128xi32, #tpu.memory_space<vmem>>, %arg4: memref<1x8x32xbf16, #tpu.memory_space<vmem>>, %arg5: memref<1x32x128xbf16, #tpu.memory_space<vmem>>, %arg6: memref<1x8x128xf32, #tpu.memory_space<vmem>>) attributes {dimension_semantics = [#tpu.dimension_semantics<parallel>, #tpu.dimension_semantics<parallel>], iteration_bounds = array<i64: 2, 1>, scalar_prefetch = 0 : i64, scratch_operands = 0 : i64, tpu.core_type = #tpu.core_type<tc>, window_params = [{transform_indices = @transform_0, window_bounds = array<i64: 1, 8, 1>}, {transform_indices = @transform_1, window_bounds = array<i64: 1, 1, 128>}, {transform_indices = @transform_2, window_bounds = array<i64: 1, 8, 32>}, {transform_indices = @transform_3, window_bounds = array<i64: 1, 32, 128>}, {transform_indices = @transform_4, window_bounds = array<i64: 1, 8, 128>}]} {
    %c0 = arith.constant 0 : index
    %c0_0 = arith.constant 0 : index
    %c0_1 = arith.constant 0 : index
    %0 = vector.load %arg2[%c0, %c0_0, %c0_1] : memref<1x8x1xi32, #tpu.memory_space<vmem>>, vector<1x8x1xi32>
    %c0_2 = arith.constant 0 : index
    %c0_3 = arith.constant 0 : index
    %c0_4 = arith.constant 0 : index
    %1 = vector.load %arg3[%c0_2, %c0_3, %c0_4] : memref<1x1x128xi32, #tpu.memory_space<vmem>>, vector<1x1x128xi32>
    %c0_i32 = arith.constant 0 : i32
    %2 = vector.broadcast %c0_i32 : i32 to vector<1x8x1xi32>
    %3 = arith.minsi %0, %2 : vector<1x8x1xi32>
    %c0_i32_5 = arith.constant 0 : i32
    %4 = vector.broadcast %c0_i32_5 : i32 to vector<1x1x128xi32>
    %5 = arith.minsi %1, %4 : vector<1x1x128xi32>
    %6 = vector.broadcast %3 : vector<1x8x1xi32> to vector<1x8x128xi32>
    %7 = vector.broadcast %5 : vector<1x1x128xi32> to vector<1x8x128xi32>
    %8 = arith.cmpi eq, %6, %7 : vector<1x8x128xi32>
    %c0_i32_6 = arith.constant 0 : i32
    %9 = vector.broadcast %c0_i32_6 : i32 to vector<1x8x1xi32>
    %10 = arith.cmpi slt, %3, %9 : vector<1x8x1xi32>
    %11 = vector.broadcast %10 : vector<1x8x1xi1> to vector<1x8x128xi1>
    %12 = arith.andi %8, %11 : vector<1x8x128xi1>
    %13 = arith.extui %12 : vector<1x8x128xi1> to vector<1x8x128xi32>
    %14 = arith.sitofp %13 : vector<1x8x128xi32> to vector<1x8x128xf32>
    %c0_7 = arith.constant 0 : index
    %c0_8 = arith.constant 0 : index
    %c0_9 = arith.constant 0 : index
    %15 = vector.load %arg4[%c0_7, %c0_8, %c0_9] : memref<1x8x32xbf16, #tpu.memory_space<vmem>>, vector<1x8x32xbf16>
    %c0_10 = arith.constant 0 : index
    %c0_11 = arith.constant 0 : index
    %c0_12 = arith.constant 0 : index
    %16 = vector.load %arg5[%c0_10, %c0_11, %c0_12] : memref<1x32x128xbf16, #tpu.memory_space<vmem>>, vector<1x32x128xbf16>
    "tpu.trace_start"() <{level = 10 : i32, message = "bah,bhd->bad"}> : () -> ()
    %cst = arith.constant dense<0.000000e+00> : vector<1x8x128xf32>
    %17 = tpu.matmul %15, %16, %cst {dimension_numbers = #tpu.dot_dimension_numbers<[2], [1], [1], [2], [0, 0, 0, 1, 1, 2], [0], [0]>} : vector<1x8x32xbf16>, vector<1x32x128xbf16>, vector<1x8x128xf32> -> vector<1x8x128xf32>
    "tpu.trace_stop"() : () -> ()
    %18 = arith.extf %15 : vector<1x8x32xbf16> to vector<1x8x32xf32>
    %19 = arith.extf %16 : vector<1x32x128xbf16> to vector<1x32x128xf32>
    %20 = arith.mulf %18, %18 : vector<1x8x32xf32>
    %cst_13 = arith.constant dense<0.000000e+00> : vector<1x8xf32>
    %21 = vector.multi_reduction <add>, %20, %cst_13 [2] : vector<1x8x32xf32> to vector<1x8xf32>
    %22 = vector.shape_cast %21 : vector<1x8xf32> to vector<1x8x1xf32>
    %cst_14 = arith.constant 1.000000e-18 : f32
    %23 = vector.broadcast %cst_14 : f32 to vector<1x8x1xf32>
    %24 = arith.addf %22, %23 : vector<1x8x1xf32>
    %25 = math.rsqrt %24 : vector<1x8x1xf32>
    %26 = arith.mulf %19, %19 : vector<1x32x128xf32>
    %cst_15 = arith.constant dense<0.000000e+00> : vector<1x128xf32>
    %27 = vector.multi_reduction <add>, %26, %cst_15 [1] : vector<1x32x128xf32> to vector<1x128xf32>
    %28 = vector.shape_cast %27 : vector<1x128xf32> to vector<1x1x128xf32>
    %cst_16 = arith.constant 1.000000e-18 : f32
    %29 = vector.broadcast %cst_16 : f32 to vector<1x1x128xf32>
    %30 = arith.addf %28, %29 : vector<1x1x128xf32>
    %31 = math.rsqrt %30 : vector<1x1x128xf32>
    %32 = vector.broadcast %25 : vector<1x8x1xf32> to vector<1x8x128xf32>
    %33 = arith.mulf %17, %32 : vector<1x8x128xf32>
    %34 = vector.broadcast %31 : vector<1x1x128xf32> to vector<1x8x128xf32>
    %35 = arith.mulf %33, %34 : vector<1x8x128xf32>
    %c0_i32_17 = arith.constant 0 : i32
    %36 = vector.broadcast %c0_i32_17 : i32 to vector<1x8x1xi32>
    %37 = arith.cmpi sgt, %0, %36 : vector<1x8x1xi32>
    %c0_i32_18 = arith.constant 0 : i32
    %38 = vector.broadcast %c0_i32_18 : i32 to vector<1x1x128xi32>
    %39 = arith.cmpi sgt, %1, %38 : vector<1x1x128xi32>
    %40 = vector.broadcast %37 : vector<1x8x1xi1> to vector<1x8x128xi1>
    %41 = vector.broadcast %39 : vector<1x1x128xi1> to vector<1x8x128xi1>
    %42 = arith.andi %40, %41 : vector<1x8x128xi1>
    %cst_19 = arith.constant 0.000000e+00 : f32
    %43 = vector.broadcast %cst_19 : f32 to vector<1x8x128xf32>
    %44 = arith.select %42, %35, %43 : vector<1x8x128xi1>, vector<1x8x128xf32>
    %45 = arith.addf %14, %44 : vector<1x8x128xf32>
    %c0_20 = arith.constant 0 : index
    %c0_21 = arith.constant 0 : index
    %c0_22 = arith.constant 0 : index
    %46 = vector.load %arg6[%c0_20, %c0_21, %c0_22] : memref<1x8x128xf32, #tpu.memory_space<vmem>>, vector<1x8x128xf32>
    tpu.vector_store %arg6[%c0_20, %c0_21, %c0_22], %45 {strides = array<i32>} : memref<1x8x128xf32, #tpu.memory_space<vmem>>, vector<1x8x128xf32>,
    return
  }
  func.func @transform_0(%arg0: i32, %arg1: i32) -> (i32, i32, i32) {
    %c0_i32 = arith.constant 0 : i32
    %c0_i32_0 = arith.constant 0 : i32
    %c0_i32_1 = arith.constant 0 : i32
    return %arg0, %c0_i32, %c0_i32_0 : i32, i32, i32
  }
  func.func @transform_1(%arg0: i32, %arg1: i32) -> (i32, i32, i32) {
    %c0_i32 = arith.constant 0 : i32
    %c0_i32_0 = arith.constant 0 : i32
    return %arg0, %c0_i32, %arg1 : i32, i32, i32
  }
  func.func @transform_2(%arg0: i32, %arg1: i32) -> (i32, i32, i32) {
    %c0_i32 = arith.constant 0 : i32
    %c0_i32_0 = arith.constant 0 : i32
    %c0_i32_1 = arith.constant 0 : i32
    return %arg0, %c0_i32, %c0_i32_0 : i32, i32, i32
  }
  func.func @transform_3(%arg0: i32, %arg1: i32) -> (i32, i32, i32) {
    %c0_i32 = arith.constant 0 : i32
    %c0_i32_0 = arith.constant 0 : i32
    return %arg0, %c0_i32, %arg1 : i32, i32, i32
  }
  func.func @transform_4(%arg0: i32, %arg1: i32) -> (i32, i32, i32) {
    %c0_i32 = arith.constant 0 : i32
    %c0_i32_0 = arith.constant 0 : i32
    return %arg0, %c0_i32, %arg1 : i32, i32, i32
  }
}

</mosaic_0001>

<bundles_post_ra>
// kernel: tpu_custom_call.1
= control target key start
LH: loop header
LB: loop body
LE: loop exit
PB: predicated region body
PF: predicated region fallthrough
CT: control target
= control target key end

     0   :  { %9 = vsyncpa [#allocation3], 0  ;;  %s1003_s0 = inlined_call_operand.vmem [shape: s32[2,8,1], index: 0, kind: input, shape index: {}]   ;;  %s1004_s1 = inlined_call_operand.vmem [shape: s32[2,1,128], index: 1, kind: input, shape index: {}]   ;;  %s1005_s2 = inlined_call_operand.vmem [shape: bf16[2,8,32], index: 2, kind: input, shape index: {}]   ;;  %s1006_s3 = inlined_call_operand.hbm [shape: bf16[2,32,128], index: 3, kind: input, shape index: {}]   ;;  %s1007_s4 = inlined_call_operand.hbm [shape: f32[2,8,128], index: 4, kind: output, shape index: {}]  }
   0x1   :  { %11 = vsyncpa [#allocation3 + $0x1], 0 }
   0x2   :  { %12 = vsyncpa [#allocation4], 0 }
   0x3   :  { %14 = vsyncpa [#allocation4 + $0x1], 0  ;;  %s809_s15 = smov 0   ;;  %s811_s16 = smov 0  }
   0x4   :  { %s813_s17 = smov 0   ;;  %s815_s18 = smov 0  }
   0x5   :  { %s817_s19 = smov 0   ;;  %s819_s20 = smov 0  }
   0x6 LB: > { %s554_s21 = sadd.s32 4294967295, %s775_s20   ;;  %s555_s22 = sadd.s32 4294967294, %s775_s20   ;;  %s775_s20 = sphi %s819_s20, %s20_s20   ;;  %s771_s19 = sphi %s817_s19, %s1022_s19   ;;  %s767_s18 = sphi %s815_s18, %s1021_s18   ;;  %s763_s17 = sphi %s813_s17, %s1020_s17   ;;  %s759_s16 = sphi %s811_s16, %s1019_s16   ;;  %s755_s15 = sphi %s809_s15, %s1018_s15  }
   0x7   : > { %s32_s23 = sadd.s32 1, %s771_s19  ;;  %s121_s24 = sadd.s32 1, %s763_s17 }
   0x8   : > { %p34_p0 = scmp.ge.s32.totalorder %s32_s23, 2  ;;  %p128_p1 = scmp.ne.s32.totalorder %s763_s17, %s759_s16 }
   0x9   : > { %p129_p2 = scmp.eq.s32.totalorder %s775_s20, 0  ;;  %p134_p3 = scmp.ne.s32.totalorder %s759_s16, %s755_s15 }
   0xa   : > { %s1024_s23 = smov (%p34_p0, %s32_s23), 0  ;;  %p135_p5 = scmp.eq.s32.totalorder %s554_s21, 0 }
   0xb   : > { %p850_p4 = por %p129_p2, %p128_p1  ;;  %s116_s26 = ssub.s32 %s771_s19, %s1024_s23 }
   0xc   : > { %p160_p6 = scmp.eq.s32.totalorder %s554_s21, 1  ;;  %p119_p7 = scmp.eq.s32.totalorder %s116_s26, 0 }
   0xd   : > { %p856_p8 = por %p135_p5, %p134_p3  ;;  %p166_p10 = scmp.eq.s32.totalorder %s555_s22, 1 }
   0xe   : > { %p860_p9 = por %p160_p6, %p128_p1  ;;  %p598_p13 = scmp.lt.s32.totalorder %s775_s20, 2 }
   0xf   : > { %s865_s29 = scalar_select %p119_p7, %s763_s17, %s121_s24  }
  0x10   : > { %s1011_s28 = scalar_select %p860_p9, 1, 0 }
  0x11   : > { %p867_p11 = por %p166_p10, %p134_p3  ;;  %s209_s5 = sand.u32 1, %s763_s17  }
  0x12   : > { %s558_s6 = sshll.u32 %s209_s5, 4  ;;  %s574_s7 = sshll.u32 %s771_s19, 8 }
  0x13   : > { %s1012_s30 = scalar_select %p867_p11, 1, 0 }
  0x14   : > { %s878_s10 = scalar_lea.hbm %s1006_s3, %s574_s7  ;;  %s213_s11 = scalar_lea.vmem [#allocation2], %s558_s6 }
  0x15   : > { %s221_s12 = sshll.u32 %s213_s11, 4  ;;  %p884_p0 = pnand %p598_p13, %p850_p4  ;;  %s880_s12 = int_to_ptr.vmem [resolvable:$true] %s221_s12 }
  0x16   : > { %s889_s14 = scalar_lea.sflag [#allocation3], %s209_s5  ;;  %s663_s21 = scalar_lea.hbm %s878_s10, 256 }
  0x17   : > { %p664_p2 = scmp.ne.s32.totalorder %s878_s10, %s663_s21  ;;  %p665_p3 = pneg %p884_p0 }
  0x18   : > { %s668_s25 = scalar_lea.hbm %s1006_s3, 512  ;;  %p669_p4 = scmp.lt.u32.totalorder %s878_s10, %s1006_s3 }
  0x19   : > { %p666_p5 = pnand %p665_p3, %p664_p2  ;;  %p670_p7 = scmp.lt.u32.totalorder %s668_s25, %s663_s21 }
  0x1a   : > { %p672_p13 = scmp.lt.u32.totalorder %s663_s21, %s878_s10 }
  0x1b   : > { %p667_p6 = pneg %p666_p5  ;;  %p671_p10 = por %p670_p7, %p669_p4 }
  0x1d   : > { %p673_p12 = por %p672_p13, %p671_p10 }
  0x1f   : > { %p674_p1 = pnand %p673_p12, %p667_p6 }
  0x21   : > { %677 = shalt.err (!%p674_p1)
}
  0x22   : > { %s678_s5 = scalar_lea.vmem %s880_s12, 256  ;;  %s777_s7 = smov [#allocation2]  }
  0x23   : > { %p679_p2 = scmp.ne.s32.totalorder %s880_s12, %s678_s5  ;;  %s683_s8 = sshll.u32 %s777_s7, 4  ;;  %s684_s8 = int_to_ptr.vmem [resolvable:$false] %s683_s8 }
  0x24   : > { %s685_s9 = scalar_lea.vmem %s684_s8, 512  ;;  %p686_p9 = scmp.lt.s32.totalorder %s880_s12, %s684_s8 }
  0x25   : > { %p681_p5 = pnand %p679_p2, %p665_p3  ;;  %p687_p4 = scmp.lt.s32.totalorder %s685_s9, %s678_s5 }
  0x27   : > { %p682_p11 = pneg %p681_p5  ;;  %p688_p7 = por %p687_p4, %p686_p9 }
  0x29   : > { %p689_p10 = pnand %p688_p7, %p682_p11 }
  0x2b   : > { %692 = shalt.err (!%p689_p10)
}
  0x2c   : > { %s778_s11 = smov 64   ;;  %s779_s21 = smov 4  }
  0x2d   : > { %593 = dma.hbm_to_vmem [thread:$0]  (!%p884_p0), %s878_s10, 256, %s880_s12, %s889_s14, %s778_s11, %s778_s11, %s779_s21  }
  0x2e   : > { %p229_p12 = scmp.lt.s32.totalorder %s775_s20, 3  ;;  %p1014_p1 = scmp.ge.s32.totalorder %s775_s20, 1 }
  0x30   : > { %p230_p3 = pnand %p1014_p1, %p229_p12 }
  0x31   : > { %s921_s22 = sand.u32 (!%p230_p3), 1, %s759_s16  }
  0x32   : > { %233 = sbr.rel (%p230_p3) target bundleno = 301 (0x12d), region = 36  ;;  %s562_s24 = sshll.u32 (!%p230_p3), %s921_s22, 4 }
  0x33   : > { %s236_s25 = scalar_lea.sflag (!%p230_p3), [#allocation3], %s921_s22  ;;  %s239_s26 = scalar_lea.vmem (!%p230_p3), [#allocation2], %s562_s24 }
  0x39   : > { %746 = dma.done.wait (%p856_p8), %s236_s25, 256  }
  0x3a   : > { %748 = vsyncadd (%p856_p8), %s236_s25, 4294967040  ;;  %p278_p9 = scmp.lt.s32.totalorder %s767_s18, 1  ;;  %v780_v0 = vmov 0.0   ;;  %vm781_vm0 = vmmov 0   ;;  %v782_v1 = vmov 0   ;;  %v317_v2 = vld [vmem:[%s239_s26] sm:$0xff]   ;;  %v302_v32 = vlaneseq }
  0x3b   : > { %578 = vmatprep.subr.bf16.mxu0 %v780_v0  ;;  %582 = vmatprep.mubr.msk.bf16.mxu0 %vm781_vm0, %v780_v0  ;;  %v319_v3 = vld [vmem:[%s239_s26 + $0x8] sm:$0xff]   ;;  %v378_v4 = vunpack.c.l.bf16 %v317_v2  ;;  %v379_v5 = vunpack.c.h.bf16 %v317_v2  ;;  %vm333_vm4 = vcmask 261120   ;;  %s563_s24 = sshll.u32 %s921_s22, 3  ;;  %s571_s25 = sshll.u32 %s767_s18, 7 }
  0x3c   : > { %s933_s10 = scalar_select %p278_p9, %s767_s18, 1  ;;  %654 = vset.pattern.permute.xlu1 %v782_v1  ;;  %653 = vset.pattern.permute.xlu0 %v782_v1  ;;  %v380_v8 = vunpack.c.l.bf16 %v319_v3  ;;  %v381_v9 = vunpack.c.h.bf16 %v319_v3  ;;  %v303_v35 = vshrl.u32 %v302_v32, 7 }
  0x3d   : > { %579 = vmatpush3.bf16.msra.mxu0 %v317_v2  ;;  %v388_v11 = vmul.f32 %v378_v4, %v378_v4  ;;  %v389_v12 = vmul.f32 %v379_v5, %v379_v5  ;;  %s277_s26 = scalar_lea.vmem [#allocation5], %s563_s24  ;;  %s954_s27 = scalar_lea.hbm %s1007_s4, %s571_s25 }
  0x3e   : > { %s565_s12 = sshll.u32 %s933_s10, 2  ;;  %s564_s13 = sshll.u32 %s933_s10, 3  ;;  %580 = vmatprep.subr.bf16.mxu0 %v780_v0  ;;  %v390_v14 = vmul.f32 %v380_v8, %v380_v8  ;;  %v391_v17 = vmul.f32 %v381_v9, %v381_v9  ;;  %v304_v36 = vsub.s32 0, %v303_v35 }
  0x3f   : > { %s291_s6 = scalar_lea.vmem %s1005_s2, %s565_s12  ;;  %s281_s8 = scalar_lea.vmem %s1003_s0, %s564_s13  ;;  %v392_v16 = vadd.f32 %v389_v12, %v388_v11 }
  0x40   : > { %v316_v6 = vld [vmem:[%s291_s6] sm:$0xf]  ;;  %s287_s21 = scalar_lea.vmem %s1004_s1, %s933_s10  ;;  %s437_s10 = sshll.u32 %s277_s26, 4  ;;  %s956_s10 = int_to_ptr.vmem [resolvable:$true] %s437_s10 }
  0x41   : > { %v293_v7 = vld [vmem:[%s281_s8] sm:$0xff]  ;;  %v377_v10 = vunpack.c.l.bf16 %v316_v6  ;;  %581 = vmatpush3.bf16.msra.mxu0 %v319_v3  ;;  %v393_v20 = vadd.f32 %v392_v16, %v390_v14  ;;  %s423_s14 = scalar_lea.sflag [#allocation4], %s921_s22  ;;  %s693_s18 = scalar_lea.vmem %s956_s10, 128 }
  0x42   : > { %vm295_vm1 = vcmp.lt.s32.totalorder %v293_v7, 0  ;;  %vm405_vm3 = vcmp.gt.s32.totalorder %v293_v7, 0  ;;  %v294_v23 = vld [vmem:[%s287_s21] sm:$0x1]  ;;  %p694_p8 = scmp.ne.s32.totalorder %s956_s10, %s693_s18  ;;  %p1015_p11 = scmp.ne.s32.totalorder %s1011_s28, 0 }
  0x43   : > { %v296_v13 = vsel %vm295_vm1, %v293_v7, 0  ;;  %v382_v15 = vmul.f32 %v377_v10, %v377_v10  ;;  %v407_v21 = vsel %vm405_vm3, 1, %v782_v1  ;;  %v394_v22 = vadd.f32 %v393_v20, %v391_v17  ;;  %s783_s6 = smov [#allocation5]  }
  0x44   : > { %vm307_vm2 = vcmp.lt.s32.totalorder %v296_v13, 0  ;;  %583 = vmatmul.mubr.msk.bf16.vlgmr.msra.gmra.mrb[0].mxu0 %vm333_vm4, %v316_v6  ;;  %vm406_vm5 = vcmp.gt.s32.totalorder %v294_v23, 0  ;;  %vm297_vm6 = vcmp.lt.s32.totalorder %v294_v23, 0  ;;  %p695_p0 = pnand %p694_p8, %p1015_p11  ;;  %s697_s5 = sshll.u32 %s783_s6, 4  ;;  %s698_s5 = int_to_ptr.vmem [resolvable:$false] %s697_s5 }
  0x45   : > { %v308_v18 = vsel %vm307_vm2, 1, %v782_v1  ;;  %v383_v19 = vsel %vm333_vm4, %v382_v15, 0.0  ;;  %v412_v24 = vsel %vm406_vm5, 1, %v782_v1  ;;  %v395_v25 = vrot.slane %v394_v22, 4  ;;  %s699_s7 = scalar_lea.vmem %s698_s5, 256  ;;  %p700_p13 = scmp.lt.s32.totalorder %s956_s10, %s698_s5 }
  0x46   : > { %310 = vperm.xlu1 %654, %v308_v18   ;;  %384 = vadd.xlane.f32.xlu0 %v383_v19  ;;  %v298_v38 = vsel %vm297_vm6, %v294_v23, 0  ;;  %v416_v41 = vrot.slane %v412_v24, %v304_v36  ;;  %p696_p6 = pneg %p695_p0  ;;  %p701_p2 = scmp.lt.s32.totalorder %s699_s7, %s693_s18 }
  0x47   : > { %v396_v26 = vadd.f32 %v395_v25, %v394_v22  ;;  %v305_v39 = vrot.slane %v298_v38, %v304_v36 }
  0x48   : > { %vm417_vm9 = vcmp.eq.s32.totalorder %v416_v41, 1  ;;  %p702_p5 = por %p701_p2, %p700_p13 }
  0x49   : > { %v397_v27 = vrot.slane %v396_v26, 2 }
  0x4a   : > { %409 = vperm.xlu1 %654, %v407_v21   ;;  %p703_p4 = pnand %p702_p5, %p696_p6 }
  0x4b   : > { %v398_v28 = vadd.f32 %v397_v27, %v396_v26 }
  0x4d   : > { %v399_v29 = vrot.slane %v398_v28, 1 }
  0x4f   : > { %v400_v31 = vadd.f32 %v399_v29, %v398_v28 }
  0x51   : > { %v401_v34 = vadd.f32 1e-18, %v400_v31 }
  0x5c   : > { %300 = vperm.xlu0 %653, %v296_v13  }
  0xc5   : > { %v311_v37 = vpop.permute.xlu1 %310 }
  0xc6   : > { %vm312_vm7 = vcmp.eq.s32.totalorder %v311_v37, 1 }
  0xc9   : > { %v410_v43 = vpop.permute.xlu1 %409 }
  0xca   : > { %vm411_vm10 = vcmp.eq.s32.totalorder %v410_v43, 1 }
  0xcb   : > { %vm418_vm12 = vmand %vm411_vm10, %vm417_vm9 }
  0xd3   : > { %v385_v30 = vpop.xlane.xlu0 %384 }
  0xd4   : > { %v386_v33 = vadd.f32 1e-18, %v385_v30 }
  0xd6   : > { %659 = vrsqrt.f32 %v386_v33 }
  0xd7   : > { %661 = vrsqrt.f32 %v401_v34 }
  0xdb   : > { %v301_v40 = vpop.permute.xlu0 %300 }
  0xdc   : > { %vm306_vm8 = vcmp.eq.s32.totalorder %v301_v40, %v305_v39 }
  0xdd   : > { %vm313_vm11 = vmand %vm306_vm8, %vm312_vm7 }
  0xde   : > { %v566_v51 = vsel %vm313_vm11, 1.0, %v780_v0 }
  0xe0   : > { %v660_v42 = vpop.eup %659 }
  0xe1   : > { %v662_v44 = vpop.eup %661 }
 0x117   : > { %v371_v45 = vpop.f32.mrb[0].mxu0 }
 0x118   : > { %v403_v46 = vmul.f32 %v660_v42, %v371_v45  ;;  %v584_v47 = vpop.f32.mrb[1].mxu0 }
 0x119   : > { %v374_v48 = vpop.f32.mrb[2].mxu0 }
 0x11a   : > { %v404_v49 = vmul.f32 %v662_v44, %v403_v46  ;;  %v585_v50 = vpop.f32.mrb[3].mxu0 }
 0x11c   : > { %v419_v52 = vsel %vm418_vm12, %v404_v49, 0.0 }
 0x11d   : > { %v420_v53 = vadd.f32 %v566_v51, %v419_v52 }
 0x11f   : > { %421 = vst [vmem:[%s277_s26] sm:$0xff] %v420_v53 }
 0x120   : > { %706 = shalt.err (!%p703_p4)
}
 0x121   : > { %s707_s22 = scalar_lea.hbm %s954_s27, 128  ;;  %s711_s11 = scalar_lea.hbm %s1007_s4, 256 }
 0x122   : > { %p708_p7 = scmp.ne.s32.totalorder %s954_s27, %s707_s22  ;;  %p712_p1 = scmp.lt.u32.totalorder %s954_s27, %s1007_s4 }
 0x123   : > { %p713_p3 = scmp.lt.u32.totalorder %s711_s11, %s707_s22  ;;  %p715_p8 = scmp.lt.u32.totalorder %s707_s22, %s954_s27 }
 0x124   : > { %p709_p10 = pnand %p708_p7, %p1015_p11 }
 0x125   : > { %p714_p9 = por %p713_p3, %p712_p1 }
 0x126   : > { %p710_p12 = pneg %p709_p10 }
 0x127   : > { %p716_p0 = por %p715_p8, %p714_p9 }
 0x129   : > { %p717_p6 = pnand %p716_p0, %p710_p12 }
 0x12b   : > { %720 = shalt.err (!%p717_p6)
}
 0x12c   : > { %588 = dma.vmem_to_hbm [thread:$0]  (%p1015_p11), %s956_s10, 128, %s954_s27, %s423_s14  }
 0x12d PF: > { %s449_s25 = sand.u32 1, %s755_s15   ;;  %p1016_p13 = scmp.ne.s32.totalorder %s1012_s30, 0 }
 0x12e   : > { %p1017_p2 = scmp.ge.s32.totalorder %s775_s20, 2  ;;  %s450_s26 = scalar_lea.sflag [#allocation4], %s449_s25 }
 0x130   : > { %p595_p5 = pnand %p1017_p2, %p1016_p13 }
 0x132   : > { %750 = dma.done.wait (!%p595_p5), %s450_s26, 128  }
 0x133   : > { %752 = vsyncadd (!%p595_p5), %s450_s26, 4294967168  ;;  %s20_s20 = sadd.s32 1, %s775_s20   ;;  %s1018_s15 = smov %s759_s16 }
 0x134   : > { %p17_p4 = scmp.ge.s32.totalorder %s20_s20, 4   ;;  %s1019_s16 = smov %s763_s17 }
 0x135   : > { %s1020_s17 = smov %s865_s29  ;;  %s1021_s18 = smov %s771_s19 }
 0x136   : > { %s1022_s19 = smov %s1024_s23  ;;  %19 = sbr.rel (!%p17_p4) target bundleno = 6 (0x6), region = 90 }
 0x13d   :  { %455 = vsyncpa [#allocation3], 1 }
 0x13e   :  { %457 = vsyncpa [#allocation3 + $0x1], 1 }
 0x13f   :  { %458 = vsyncpa [#allocation4], 1 }
 0x140   :  { %460 = vsyncpa [#allocation4 + $0x1], 1 }

</bundles_post_ra>
